<compile_context>
chip_gen: v5e
topology: v5e:2x2
jax: 0.10.0
libtpu: 0.0.40
codegen_flags: <defaults>
</compile_context>

<pallas_src>
import jax
import jax.numpy as jnp
from jax.experimental import pallas as pl
from jax.experimental.pallas import tpu as pltpu


def _mlp_projector_kernel(x_ref, w1_ref, b1_ref, w2_ref, b2_ref, z_ref):
    """Fused Linear -> ReLU -> Linear on one (TB, in_dim) batch tile."""
    h = jnp.dot(x_ref[...], w1_ref[...], preferred_element_type=jnp.float32)
    h = jnp.maximum(h + b1_ref[...], 0.0)
    z = jnp.dot(h, w2_ref[...], preferred_element_type=jnp.float32)
    z_ref[...] = (z + b2_ref[...]).astype(z_ref.dtype)


def _linear_projector_kernel(x_ref, w_ref, b_ref, z_ref):
    """Single Linear on one (TB, in_dim) batch tile (hidden_dim=None variant)."""
    z = jnp.dot(x_ref[...], w_ref[...], preferred_element_type=jnp.float32)
    z_ref[...] = (z + b_ref[...]).astype(z_ref.dtype)


def _round_up(n, m):
    return ((n + m - 1) // m) * m


def projector_forward(x, params, *, block_b=None):
    """Projector forward: x [B, in_dim] -> z [B, out_dim].

    params = (w1, b1, w2, b2) for the hidden variant, or (w, b) for the
    hidden_dim=None variant.  Weights are stored [in, out] (PyTorch W^T).
    """
    B, in_dim = x.shape
    x = x.astype(jnp.float32)

    # Batch tile: multiple of 8 (sublane-dense stores), capped so a tile plus
    # its double buffer stays far under VMEM limits on every generation.
    if block_b is None:
        block_b = min(256, _round_up(B, 8))
    block_b = _round_up(block_b, 8)
    b_pad = _round_up(B, block_b)
    if b_pad != B:
        x = jnp.pad(x, ((0, b_pad - B), (0, 0)))
    grid = (b_pad // block_b,)

    compiler_params = pltpu.CompilerParams(
        dimension_semantics=("parallel",),   # megacore sharding on v7x
        vmem_limit_bytes=32 * 1024 * 1024,
    )

    if len(params) == 4:
        w1, b1, w2, b2 = params
        hidden = w1.shape[1]
        out_dim = w2.shape[1]
        z = pl.pallas_call(
            _mlp_projector_kernel,
            out_shape=jax.ShapeDtypeStruct((b_pad, out_dim), jnp.float32),
            grid=grid,
            in_specs=[
                pl.BlockSpec((block_b, in_dim), lambda i: (i, 0)),
                pl.BlockSpec((in_dim, hidden), lambda i: (0, 0)),
                pl.BlockSpec((1, hidden), lambda i: (0, 0)),
                pl.BlockSpec((hidden, out_dim), lambda i: (0, 0)),
                pl.BlockSpec((1, out_dim), lambda i: (0, 0)),
            ],
            out_specs=pl.BlockSpec((block_b, out_dim), lambda i: (i, 0)),
            compiler_params=compiler_params,
        )(x, w1, b1, w2, b2)
    else:
        w, b = params
        out_dim = w.shape[1]
        z = pl.pallas_call(
            _linear_projector_kernel,
            out_shape=jax.ShapeDtypeStruct((b_pad, out_dim), jnp.float32),
            grid=grid,
            in_specs=[
                pl.BlockSpec((block_b, in_dim), lambda i: (i, 0)),
                pl.BlockSpec((in_dim, out_dim), lambda i: (0, 0)),
                pl.BlockSpec((1, out_dim), lambda i: (0, 0)),
            ],
            out_specs=pl.BlockSpec((block_b, out_dim), lambda i: (i, 0)),
            compiler_params=compiler_params,
        )(x, w, b)

    return z[:B]


def project_two_views(x1, x2, params):
    """SimCLR usage: project both views with a single kernel launch."""
    B = x1.shape[0]
    z = projector_forward(jnp.concatenate([x1, x2], axis=0), params)
    return z[:B], z[B:]


def init_params(key, in_dim, hidden_dim=None, out_dim=128):
    if hidden_dim is None:
        k = jax.random.split(key, 2)
        w = 0.1 * jax.random.normal(k[0], (in_dim, out_dim), jnp.float32)
        b = 0.1 * jax.random.normal(k[1], (1, out_dim), jnp.float32)
        return (w, b)
    k = jax.random.split(key, 4)
    w1 = 0.1 * jax.random.normal(k[0], (in_dim, hidden_dim), jnp.float32)
    b1 = 0.1 * jax.random.normal(k[1], (1, hidden_dim), jnp.float32)
    w2 = 0.1 * jax.random.normal(k[2], (hidden_dim, out_dim), jnp.float32)
    b2 = 0.1 * jax.random.normal(k[3], (1, out_dim), jnp.float32)
    return (w1, b1, w2, b2)


def _reference(x, params):
    if len(params) == 4:
        w1, b1, w2, b2 = params
        h = jnp.maximum(x @ w1 + b1, 0.0)
        return h @ w2 + b2
    w, b = params
    return x @ w + b


if __name__ == "__main__":
    key = jax.random.PRNGKey(0)
    kx1, kx2, kp1, kp2 = jax.random.split(key, 4)

    B, in_dim, hidden_dim, out_dim = 2, 32, 32, 128
    x1 = jax.random.normal(kx1, (B, in_dim), jnp.float32)
    x2 = jax.random.normal(kx2, (B, in_dim), jnp.float32)

    # Hidden variant (Linear -> ReLU -> Linear), both SimCLR views, one launch.
    params_mlp = init_params(kp1, in_dim, hidden_dim=hidden_dim, out_dim=out_dim)
    z1, z2 = project_two_views(x1, x2, params_mlp)
    jax.block_until_ready((z1, z2))
    assert z1.shape == (B, out_dim) and z2.shape == (B, out_dim)
    ref = _reference(jnp.concatenate([x1, x2], axis=0), params_mlp)
    got = jnp.concatenate([z1, z2], axis=0)
    assert jnp.allclose(got, ref, atol=2e-2, rtol=2e-2)

    # hidden_dim=None variant (single Linear).
    params_lin = init_params(kp2, in_dim, hidden_dim=None, out_dim=out_dim)
    z_lin = projector_forward(x1, params_lin)
    jax.block_until_ready(z_lin)
    assert z_lin.shape == (B, out_dim)
    assert jnp.allclose(z_lin, _reference(x1, params_lin), atol=2e-2, rtol=2e-2)

    print("KERNEL_OK")
</pallas_src>

<mosaic_0001>
module attributes {stable_mosaic.version = 11 : i64} {
  func.func @_mlp_projector_kernel(%arg0: i32, %arg1: memref<8x32xf32, #tpu.memory_space<vmem>>, %arg2: memref<32x32xf32, #tpu.memory_space<vmem>>, %arg3: memref<1x32xf32, #tpu.memory_space<vmem>>, %arg4: memref<32x128xf32, #tpu.memory_space<vmem>>, %arg5: memref<1x128xf32, #tpu.memory_space<vmem>>, %arg6: memref<8x128xf32, #tpu.memory_space<vmem>>) attributes {dimension_semantics = [#tpu.dimension_semantics<parallel>], iteration_bounds = array<i64: 1>, scalar_prefetch = 0 : i64, scratch_operands = 0 : i64, tpu.core_type = #tpu.core_type<tc>, window_params = [{transform_indices = @transform_0, window_bounds = array<i64: 8, 32>}, {pipeline_mode = #tpu.pipeline_mode<synchronous>, transform_indices = @transform_1, window_bounds = array<i64: 32, 32>}, {pipeline_mode = #tpu.pipeline_mode<synchronous>, transform_indices = @transform_2, window_bounds = array<i64: 1, 32>}, {pipeline_mode = #tpu.pipeline_mode<synchronous>, transform_indices = @transform_3, window_bounds = array<i64: 32, 128>}, {pipeline_mode = #tpu.pipeline_mode<synchronous>, transform_indices = @transform_4, window_bounds = array<i64: 1, 128>}, {transform_indices = @transform_5, window_bounds = array<i64: 8, 128>}]} {
    %c0 = arith.constant 0 : index
    %c0_0 = arith.constant 0 : index
    %0 = vector.load %arg1[%c0, %c0_0] : memref<8x32xf32, #tpu.memory_space<vmem>>, vector<8x32xf32>
    %c0_1 = arith.constant 0 : index
    %c0_2 = arith.constant 0 : index
    %1 = vector.load %arg2[%c0_1, %c0_2] : memref<32x32xf32, #tpu.memory_space<vmem>>, vector<32x32xf32>
    %cst = arith.constant dense<0.000000e+00> : vector<8x32xf32>
    %2 = tpu.matmul %0, %1, %cst {dimension_numbers = #tpu.dot_dimension_numbers<[1], [0], [0], [1], [0, 0, 1, 1], [], []>} : vector<8x32xf32>, vector<32x32xf32>, vector<8x32xf32> -> vector<8x32xf32>
    %c0_3 = arith.constant 0 : index
    %c0_4 = arith.constant 0 : index
    %3 = vector.load %arg3[%c0_3, %c0_4] : memref<1x32xf32, #tpu.memory_space<vmem>>, vector<1x32xf32>
    %4 = vector.broadcast %3 : vector<1x32xf32> to vector<8x32xf32>
    %5 = arith.addf %2, %4 : vector<8x32xf32>
    %cst_5 = arith.constant 0.000000e+00 : f32
    %6 = vector.broadcast %cst_5 : f32 to vector<8x32xf32>
    %7 = arith.maximumf %5, %6 : vector<8x32xf32>
    %c0_6 = arith.constant 0 : index
    %c0_7 = arith.constant 0 : index
    %8 = vector.load %arg4[%c0_6, %c0_7] : memref<32x128xf32, #tpu.memory_space<vmem>>, vector<32x128xf32>
    %cst_8 = arith.constant dense<0.000000e+00> : vector<8x128xf32>
    %9 = tpu.matmul %7, %8, %cst_8 {dimension_numbers = #tpu.dot_dimension_numbers<[1], [0], [0], [1], [0, 0, 1, 1], [], []>} : vector<8x32xf32>, vector<32x128xf32>, vector<8x128xf32> -> vector<8x128xf32>
    %c0_9 = arith.constant 0 : index
    %c0_10 = arith.constant 0 : index
    %10 = vector.load %arg5[%c0_9, %c0_10] : memref<1x128xf32, #tpu.memory_space<vmem>>, vector<1x128xf32>
    %11 = vector.broadcast %10 : vector<1x128xf32> to vector<8x128xf32>
    %12 = arith.addf %9, %11 : vector<8x128xf32>
    %c0_11 = arith.constant 0 : index
    %c0_12 = arith.constant 0 : index
    %13 = vector.load %arg6[%c0_11, %c0_12] : memref<8x128xf32, #tpu.memory_space<vmem>>, vector<8x128xf32>
    tpu.vector_store %arg6[%c0_11, %c0_12], %12 {strides = array<i32>} : memref<8x128xf32, #tpu.memory_space<vmem>>, vector<8x128xf32>,
    return
  }
  func.func @transform_0(%arg0: i32) -> (i32, i32) {
    %c0_i32 = arith.constant 0 : i32
    %c0_i32_0 = arith.constant 0 : i32
    return %arg0, %c0_i32 : i32, i32
  }
  func.func @transform_1(%arg0: i32) -> (i32, i32) {
    %c0_i32 = arith.constant 0 : i32
    %c0_i32_0 = arith.constant 0 : i32
    %c0_i32_1 = arith.constant 0 : i32
    return %c0_i32, %c0_i32_0 : i32, i32
  }
  func.func @transform_2(%arg0: i32) -> (i32, i32) {
    %c0_i32 = arith.constant 0 : i32
    %c0_i32_0 = arith.constant 0 : i32
    %c0_i32_1 = arith.constant 0 : i32
    return %c0_i32, %c0_i32_0 : i32, i32
  }
  func.func @transform_3(%arg0: i32) -> (i32, i32) {
    %c0_i32 = arith.constant 0 : i32
    %c0_i32_0 = arith.constant 0 : i32
    %c0_i32_1 = arith.constant 0 : i32
    return %c0_i32, %c0_i32_0 : i32, i32
  }
  func.func @transform_4(%arg0: i32) -> (i32, i32) {
    %c0_i32 = arith.constant 0 : i32
    %c0_i32_0 = arith.constant 0 : i32
    %c0_i32_1 = arith.constant 0 : i32
    return %c0_i32, %c0_i32_0 : i32, i32
  }
  func.func @transform_5(%arg0: i32) -> (i32, i32) {
    %c0_i32 = arith.constant 0 : i32
    %c0_i32_0 = arith.constant 0 : i32
    return %arg0, %c0_i32 : i32, i32
  }
}

</mosaic_0001>

<bundles_post_ra>
// kernel: tpu_custom_call.1
= control target key start
LH: loop header
LB: loop body
LE: loop exit
PB: predicated region body
PF: predicated region fallthrough
CT: control target
= control target key end

     0   :  { %10 = vsyncpa [#allocation3], 0  ;;  %s316_s0 = inlined_call_operand.hbm [shape: f32[8,32], index: 0, kind: input, shape index: {}]   ;;  %s317_s1 = inlined_call_operand.hbm [shape: f32[32,32], index: 1, kind: input, shape index: {}]   ;;  %s318_s2 = inlined_call_operand.vmem [shape: f32[1,32], index: 2, kind: input, shape index: {}]   ;;  %s319_s3 = inlined_call_operand.hbm [shape: f32[32,128], index: 3, kind: input, shape index: {}]   ;;  %s320_s4 = inlined_call_operand.vmem [shape: f32[1,128], index: 4, kind: input, shape index: {}]   ;;  %s321_s5 = inlined_call_operand.hbm [shape: f32[8,128], index: 5, kind: output, shape index: {}]  }
   0x1   :  { %11 = vsyncpa [#allocation6], 0  ;;  %s28_s20 = sshll.u32 %s317_s1, 4  ;;  %s29_s20 = int_to_ptr.hbm [resolvable:$true] %s28_s20 }
   0x2   :  { %12 = vsyncpa [#allocation4], 0  ;;  %s262_s21 = smov [#allocation5]   ;;  %s18_s25 = sshll.u32 %s316_s0, 4  ;;  %s19_s25 = int_to_ptr.hbm [resolvable:$true] %s18_s25 }
   0x3   :  { %s30_s22 = sshll.u32 %s262_s21, 4  ;;  %s263_s26 = smov 128   ;;  %s31_s22 = int_to_ptr.vmem [resolvable:$true] %s30_s22 }
   0x4   :  { %s264_s27 = smov 8   ;;  %s265_s28 = smov [#allocation2]  }
   0x5   :  { %36 = dma.hbm_to_vmem [thread:$0]  %s29_s20, 512, %s31_s22, [#allocation6], %s263_s26, %s263_s26, %s264_s27  }
   0x6   :  { %s20_s29 = sshll.u32 %s265_s28, 4  ;;  %s43_s7 = sshll.u32 %s319_s3, 4  ;;  %s21_s29 = int_to_ptr.vmem [resolvable:$true] %s20_s29  ;;  %s44_s7 = int_to_ptr.hbm [resolvable:$true] %s43_s7 }
   0x7   :  { %23 = dma.hbm_to_vmem [thread:$0]  %s19_s25, 128, %s21_s29, [#allocation3]  }
   0x8   :  { %s266_s1 = smov [#allocation7]  }
   0x9   :  { %s45_s8 = sshll.u32 %s266_s1, 4  ;;  %s46_s8 = int_to_ptr.vmem [resolvable:$true] %s45_s8 }
   0xa   :  { %51 = dma.hbm_to_vmem [thread:$0]  %s44_s7, 512, %s46_s8, [#allocation6], %s263_s26, %s263_s26, %s264_s27  }
   0xb   :  { %256 = dma.done.wait [#allocation3], 128  }
   0xc   :  { %257 = vsyncadd [#allocation3], 4294967168 }
   0xd   :  { %258 = dma.done.wait [#allocation6], 1024  }
   0xe   :  { %259 = vsyncadd [#allocation6], 4294966272  ;;  %v70_v0 = vld [vmem:[#allocation5 + $0x18] sm:$0xff]  ;;  %v69_v1 = vld [vmem:[#allocation5 + $0x10] sm:$0xff]  ;;  %vm75_vm0 = vcmask 261120   ;;  %s267_s11 = smov [#allocation8]  }
   0xf   :  { %91 = vmatpush.msra.mxu0 %v70_v0  ;;  %v103_v2 = vld [vmem:[#allocation7 + $0x18] sm:$0xff]  ;;  %v68_v3 = vld [vmem:[#allocation5 + $0x8] sm:$0xff]  ;;  %v67_v4 = vld [vmem:[#allocation5] sm:$0xff]  ;;  %s137_s12 = sshll.u32 %s267_s11, 4  ;;  %s139_s15 = sshll.u32 %s321_s5, 4  ;;  %s138_s12 = int_to_ptr.vmem [resolvable:$true] %s137_s12  ;;  %s140_s15 = int_to_ptr.hbm [resolvable:$true] %s139_s15 }
  0x10   :  { %123 = vmatpush.msra.mxu1 %v103_v2  ;;  %v66_v5 = vld [vmem:[#allocation2] sm:$0xff]  ;;  %v102_v6 = vld [vmem:[#allocation7 + $0x10] sm:$0xff]  ;;  %v101_v7 = vld [vmem:[#allocation7 + $0x8] sm:$0xff] }
  0x11   :  { %92 = vmatpush.msra.mxu0 %v69_v1  ;;  %v100_v8 = vld [vmem:[#allocation7] sm:$0xff]  ;;  %v158_v9 = vld [vmem:[%s318_s2] ss:$0 sm:$0xff] }
  0x12   :  { %124 = vmatpush.msra.mxu1 %v102_v6  ;;  %v159_v13 = vld [vmem:[%s320_s4] ss:$0 sm:$0xff] }
  0x13   :  { %93 = vmatpush.msra.mxu0 %v68_v3 }
  0x14   :  { %125 = vmatpush.msra.mxu1 %v101_v7 }
  0x15   :  { %94 = vmatpush.msra.mxu0 %v67_v4 }
  0x16   :  { %150 = vmatmul.msk.f32.vlgmr.msra.gmra.mxu0 %vm75_vm0, %v66_v5  ;;  %126 = vmatpush.msra.mxu1 %v100_v8 }
  0x93   :  { %v96_v10 = vpop.f32.mrf.mxu0 }
  0x94   :  { %v97_v11 = vadd.f32 %v158_v9, %v96_v10 }
  0x96   :  { %v99_v12 = vmax.f32 %v97_v11, 0.0 }
  0x98   :  { %151 = vmatmul.msk.f32.vlgmr.msra.gmra.mxu1 %vm75_vm0, %v99_v12 }
 0x115   :  { %v128_v14 = vpop.f32.mrf.mxu1 }
 0x116   :  { %v129_v15 = vadd.f32 %v159_v13, %v128_v14 }
 0x118   :  { %131 = vst [vmem:[#allocation8] sm:$0xff] %v129_v15 }
 0x119   :  { %142 = dma.vmem_to_hbm [thread:$0]  %s138_s12, 128, %s140_s15, [#allocation4]  }
 0x11a   :  { %260 = dma.done.wait [#allocation4], 128  }
 0x11b   :  { %261 = vsyncadd [#allocation4], 4294967168 }
 0x11c   :  { %147 = vsyncpa [#allocation3], 1 }
 0x11d   :  { %148 = vsyncpa [#allocation6], 1 }
 0x11e   :  { %149 = vsyncpa [#allocation4], 1 }

</bundles_post_ra>
